<compile_context>
chip_gen: v7x
topology: tpu7x:2x2x1
jax: 0.10.0
libtpu: 0.0.40
codegen_flags: <defaults>
</compile_context>

<pallas_src>
import math
from functools import partial

import jax
import jax.numpy as jnp
from jax.experimental import pallas as pl
from jax.experimental.pallas import tpu as pltpu


# ----------------------------------------------------------------------------
# Generation-aware VMEM / tile budgets
# ----------------------------------------------------------------------------
def _vmem_budget():
    """Returns (vmem_limit_cap, per_step_target_bytes, physical_vmem_bytes)."""
    try:
        phys = int(pltpu.get_tpu_info().vmem_capacity_bytes)
    except Exception:
        phys = 64 << 20                                   # conservative default
    if phys >= (96 << 20):                                # v5e / v6e: 128 MiB
        return 64 << 20, 12 << 20, phys
    return 44 << 20, 6 << 20, phys                        # v7x-class: 64 MiB


def _pick_lane_tile(hw, rows_per_step, itemsize, target_bytes):
    """Largest divisor of hw keeping the per-step streamed footprint near
    target_bytes, preferring multiples of 128 (unmasked stores)."""
    max_lanes = max(128, target_bytes // max(rows_per_step * itemsize, 1))
    if hw <= max_lanes:
        return hw
    divs = set()
    d = 1
    while d * d <= hw:
        if hw % d == 0:
            divs.add(d)
            divs.add(hw // d)
        d += 1
    m128 = [t for t in divs if t % 128 == 0]
    if m128:
        fit = [t for t in m128 if t <= max_lanes]
        # Prefer an oversized 128-multiple tile over masked partial stores;
        # the caller raises vmem_limit to cover it.
        return max(fit) if fit else min(m128)
    fit = [t for t in divs if t <= max_lanes]
    return max(fit) if fit else hw


# ----------------------------------------------------------------------------
# Kernels
# ----------------------------------------------------------------------------
def _fused_gate_kernel(w1t_ref, scale_ref, shift_ref, w2_ref, b2_ref, y_ref,
                       *rest, n_branches, c_list, channels, inv_hw):
    """One sample: pool -> gate MLP -> sigmoid/softmax -> gated weighted sum."""
    x_refs = rest[:n_branches]
    out_ref = rest[n_branches]
    C = channels

    # ---- global average pool (per-channel column vectors) -------------------
    y_f = y_ref[0].astype(jnp.float32)                               # (C, HW)
    x_fs = [x_refs[i][0].astype(jnp.float32) for i in range(n_branches)]
    pooled = [jnp.sum(y_f, axis=-1, keepdims=True) * inv_hw]         # (C, 1)
    pooled += [jnp.sum(xf, axis=-1, keepdims=True) * inv_hw for xf in x_fs]

    # ---- gate MLP: conv1(1x1) -> BN(eval) -> ReLU -> conv2(1x1) -------------
    # Pure VPU + XLU reductions (no MXU matvecs); channelpad: padded channels
    # pool to zero so their weight rows are simply skipped.
    mid = w1t_ref.shape[1]
    h = jnp.zeros((1, mid), jnp.float32)
    for j, p in enumerate(pooled):
        cj = p.shape[0]
        w_seg = w1t_ref[j * C:j * C + cj, :]                         # (cj, mid)
        h = h + jnp.sum(w_seg * p, axis=0, keepdims=True)
    h = jnp.maximum(h * scale_ref[...] + shift_ref[...], 0.0)        # (1, mid)
    logits = jnp.sum(w2_ref[...] * h, axis=1, keepdims=True) + b2_ref[...]

    # ---- gates: sigmoid on y, softmax across the inbound branches -----------
    g_y = 1.0 / (1.0 + jnp.exp(-logits[0:C, :]))                     # (C, 1)
    br = [logits[(i + 1) * C:(i + 2) * C, :] for i in range(n_branches)]
    m = br[0]
    for l in br[1:]:
        m = jnp.maximum(m, l)
    exps = [jnp.exp(l - m) for l in br]
    denom = exps[0]
    for e in exps[1:]:
        denom = denom + e

    # ---- gated weighted sum: f32 accumulator, single store ------------------
    acc = y_f * g_y
    for i in range(n_branches):
        ci = c_list[i]
        g_i = exps[i][0:ci, :] / denom[0:ci, :]                      # (ci, 1)
        contrib = x_fs[i] * g_i                                      # (ci, HW)
        if ci == C:
            acc = acc + contrib
        else:  # channelpad: only the leading ci rows receive this branch
            acc = jnp.concatenate([acc[0:ci, :] + contrib, acc[ci:, :]], axis=0)
    out_ref[0] = acc.astype(out_ref.dtype)


def _gated_sum_kernel(gates_ref, y_ref, *rest, n_branches, c_list, channels):
    """One (1, C, TL) tile of: out = y * g_y + sum_i x_i * g_i (f32 acc)."""
    x_refs = rest[:n_branches]
    out_ref = rest[n_branches]
    C = channels

    g_y = gates_ref[0, 0, :, :]                                      # (C, 1)
    acc = y_ref[0].astype(jnp.float32) * g_y
    for i in range(n_branches):
        ci = c_list[i]
        g_i = gates_ref[0, i + 1, 0:ci, :]                           # (ci, 1)
        contrib = x_refs[i][0].astype(jnp.float32) * g_i             # (ci, TL)
        if ci == C:
            acc = acc + contrib
        else:
            acc = jnp.concatenate([acc[0:ci, :] + contrib, acc[ci:, :]], axis=0)
    out_ref[0] = acc.astype(out_ref.dtype)                           # single store


# ----------------------------------------------------------------------------
# Wrapper
# ----------------------------------------------------------------------------
def gate_junction_forward(y, x_list, inbounds, params, eps=1e-5, mode="auto"):
    """Pallas implementation of GateJunction.forward.

    y: (N, C, H, W); x_list[i]: (N, C_i, H, W) with C_i <= C (NCHW layout).
    mode: "auto" | "fused" | "split".
    """
    N, C, H, W = y.shape
    xs = [x_list[i] for i in inbounds]
    k = len(xs)
    c_list = [int(x.shape[1]) for x in xs]
    assert all(ci <= C for ci in c_list)
    HW = H * W
    itemsize = y.dtype.itemsize

    limit_cap, step_target, phys = _vmem_budget()

    # BN (eval-mode) folded affine, shared by both paths.
    scale = (params["bn_gamma"] / jnp.sqrt(params["bn_var"] + eps)).astype(jnp.float32)
    shift = (params["bn_beta"] - params["bn_mean"] * scale).astype(jnp.float32)

    y2 = y.reshape(N, C, HW)
    xs2 = [x.reshape(N, ci, HW) for x, ci in zip(xs, c_list)]

    mid = int(params["w1"].shape[0])
    n_out = (1 + k) * C
    rows_per_sample = 2 * C + sum(c_list)               # y + out + all branches
    sample_bytes = rows_per_sample * HW * itemsize
    # Padded-ish estimate of resident gate-MLP params in VMEM.
    param_bytes = (2 * n_out * 128 + 2 * 128 + n_out * 128) * 4
    fused_needed = 2 * sample_bytes + param_bytes + (2 << 20)
    use_fused = (mode == "fused") or (mode == "auto" and fused_needed <= limit_cap)

    if use_fused:
        # ----------------------- FUSED single-pass path ----------------------
        w1t = params["w1"].astype(jnp.float32).T                     # (n_out, mid)
        w2 = params["w2"].astype(jnp.float32)                        # (n_out, mid)
        b2 = params["b2"].astype(jnp.float32).reshape(n_out, 1)
        scale_r = scale.reshape(1, mid)
        shift_r = shift.reshape(1, mid)

        in_specs = [
            pl.BlockSpec((n_out, mid), lambda n: (0, 0)),            # w1^T (resident)
            pl.BlockSpec((1, mid), lambda n: (0, 0)),                # BN scale
            pl.BlockSpec((1, mid), lambda n: (0, 0)),                # BN shift
            pl.BlockSpec((n_out, mid), lambda n: (0, 0)),            # w2   (resident)
            pl.BlockSpec((n_out, 1), lambda n: (0, 0)),              # b2
            pl.BlockSpec((1, C, HW), lambda n: (n, 0, 0)),           # y
        ]
        for ci in c_list:
            in_specs.append(pl.BlockSpec((1, ci, HW), lambda n: (n, 0, 0)))

        vmem_limit = int(min(max(fused_needed, 8 << 20),
                             max(limit_cap, fused_needed),
                             phys - (4 << 20)))

        kernel = partial(_fused_gate_kernel, n_branches=k, c_list=tuple(c_list),
                         channels=C, inv_hw=1.0 / float(HW))
        out = pl.pallas_call(
            kernel,
            out_shape=jax.ShapeDtypeStruct((N, C, HW), y.dtype),
            grid=(N,),
            in_specs=in_specs,
            out_specs=pl.BlockSpec((1, C, HW), lambda n: (n, 0, 0)),
            compiler_params=pltpu.CompilerParams(
                dimension_semantics=("parallel",),
                vmem_limit_bytes=vmem_limit,
            ),
        )(w1t, scale_r, shift_r, w2, b2, y2, *xs2)
        return out.reshape(N, C, H, W)

    # --------------------------- SPLIT fallback path --------------------------
    # Phase 1: pool + gate MLP on (N, (1+k)*C) vectors (tiny; plain JAX).
    pooled = [jnp.mean(y.astype(jnp.float32), axis=(2, 3))]          # (N, C)
    for x, ci in zip(xs, c_list):
        p = jnp.mean(x.astype(jnp.float32), axis=(2, 3))             # (N, C_i)
        if ci < C:                       # channelpad: padded channels pool to 0
            p = jnp.pad(p, ((0, 0), (0, C - ci)))
        pooled.append(p)
    pooled = jnp.concatenate(pooled, axis=1)                         # (N, (1+k)*C)

    h = pooled @ params["w1"].astype(jnp.float32).T                  # conv1 (1x1)
    h = jnp.maximum(h * scale + shift, 0.0)                          # BN(eval)+ReLU
    logits = h @ params["w2"].astype(jnp.float32).T + params["b2"]   # conv2 (1x1)
    w = logits.reshape(N, 1 + k, C)
    g_y = jax.nn.sigmoid(w[:, :1])
    g_x = jax.nn.softmax(w[:, 1:], axis=1)
    gates = jnp.concatenate([g_y, g_x], axis=1)[..., None].astype(jnp.float32)
    # TODO(synk): save_gate_weights (detach().cpu().numpy()) has no kernel-side
    # equivalent; `gates[:, 1:, :, 0]` could be returned here if callers need it.

    # Phase 2: gated weighted sum over a flattened 1-D parallel grid.
    TL = _pick_lane_tile(HW, rows_per_sample, itemsize, step_target)
    T = HW // TL
    step_bytes = rows_per_sample * TL * itemsize
    gate_bytes = (1 + k) * 8 * 128 * 4
    needed = 2 * step_bytes + gate_bytes + (2 << 20)
    vmem_limit = int(min(max(needed, 8 << 20), limit_cap))
    if needed > vmem_limit:              # full-HW / oversized tile: never under-budget
        vmem_limit = int(min(needed, phys - (4 << 20)))

    in_specs = [
        # Gate block index only changes with i // T -> stays resident across
        # spatial tiles of the same sample.
        pl.BlockSpec((1, 1 + k, C, 1), lambda i: (i // T, 0, 0, 0)),
        pl.BlockSpec((1, C, TL), lambda i: (i // T, 0, i % T)),      # y
    ]
    for ci in c_list:
        in_specs.append(pl.BlockSpec((1, ci, TL), lambda i: (i // T, 0, i % T)))

    kernel = partial(_gated_sum_kernel, n_branches=k, c_list=tuple(c_list), channels=C)
    out = pl.pallas_call(
        kernel,
        out_shape=jax.ShapeDtypeStruct((N, C, HW), y.dtype),
        grid=(N * T,),                   # single parallel axis -> megacore splits it
        in_specs=in_specs,
        out_specs=pl.BlockSpec((1, C, TL), lambda i: (i // T, 0, i % T)),
        compiler_params=pltpu.CompilerParams(
            dimension_semantics=("parallel",),
            vmem_limit_bytes=vmem_limit,
        ),
    )(gates, y2, *xs2)
    return out.reshape(N, C, H, W)


# ----------------------------------------------------------------------------
# Pure-JAX reference mirroring the PyTorch forward (for verification)
# ----------------------------------------------------------------------------
def gate_junction_reference(y, x_list, inbounds, params, eps=1e-5):
    N, C, H, W = y.shape
    xs = [x_list[i] for i in inbounds]
    k = len(xs)
    xs = [jnp.pad(x, ((0, 0), (0, C - x.shape[1]), (0, 0), (0, 0))) for x in xs]
    cat = jnp.concatenate([y] + xs, axis=1)
    pooled = cat.mean(axis=(2, 3))                                   # (N, (1+k)*C)
    h = pooled @ params["w1"].T
    scale = params["bn_gamma"] / jnp.sqrt(params["bn_var"] + eps)
    shift = params["bn_beta"] - params["bn_mean"] * scale
    h = jnp.maximum(h * scale + shift, 0.0)
    logits = h @ params["w2"].T + params["b2"]
    w = logits.reshape(N, 1 + k, C)
    g_y = jax.nn.sigmoid(w[:, 0, :])
    g_x = jax.nn.softmax(w[:, 1:, :], axis=1)
    out = y * g_y[:, :, None, None]
    for i in range(k):
        out = out + xs[i] * g_x[:, i, :, None, None]
    return out


if __name__ == "__main__":
    # Module config: settings[i][1] = channel count of stage i.
    settings = [(1, 4, 1), (1, 8, 1), (1, 8, 1)]
    index = 2
    inbounds = [0, 1]
    gate_reduction = 4

    C = settings[index][1]
    k = len(inbounds)
    in_channels = C * (1 + k)
    mid = math.ceil(max(C // gate_reduction, 1) / 8) * 8

    key = jax.random.PRNGKey(0)
    k1, k2, k3, k4, k5, k6, k7, k8 = jax.random.split(key, 8)
    params = {
        "w1": 0.2 * jax.random.normal(k1, (mid, in_channels), jnp.float32),
        "bn_gamma": 1.0 + 0.1 * jax.random.normal(k2, (mid,), jnp.float32),
        "bn_beta": 0.1 * jax.random.normal(k3, (mid,), jnp.float32),
        "bn_mean": jnp.zeros((mid,), jnp.float32),
        "bn_var": jnp.ones((mid,), jnp.float32),
        "w2": 0.2 * jax.random.normal(k4, ((1 + k) * C, mid), jnp.float32),
        "b2": 0.1 * jax.random.normal(k5, ((1 + k) * C,), jnp.float32),
    }

    N, H, W = 2, 16, 16
    y = jax.random.normal(k6, (N, C, H, W), jnp.float32)
    x0 = jax.random.normal(k7, (N, settings[0][1], H, W), jnp.float32)
    x1 = jax.random.normal(k8, (N, settings[1][1], H, W), jnp.float32)
    x_list = [x0, x1]

    ref = gate_junction_reference(y, x_list, inbounds, params)

    # Fused single-pass path (auto-selected at these shapes).
    out_fused = jax.block_until_ready(gate_junction_forward(y, x_list, inbounds, params))
    assert out_fused.shape == (N, C, H, W)
    assert bool(jnp.allclose(out_fused, ref, rtol=1e-4, atol=1e-4)), \
        float(jnp.max(jnp.abs(out_fused - ref)))

    # Split fallback path (exercised explicitly so both kernels are verified).
    out_split = jax.block_until_ready(
        gate_junction_forward(y, x_list, inbounds, params, mode="split"))
    assert bool(jnp.allclose(out_split, ref, rtol=1e-4, atol=1e-4)), \
        float(jnp.max(jnp.abs(out_split - ref)))

    print("KERNEL_OK")
</pallas_src>

<mosaic_0001>
module attributes {stable_mosaic.version = 11 : i64} {
  func.func @_fused_gate_kernel(%arg0: i32, %arg1: memref<24x8xf32, #tpu.memory_space<vmem>>, %arg2: memref<1x8xf32, #tpu.memory_space<vmem>>, %arg3: memref<1x8xf32, #tpu.memory_space<vmem>>, %arg4: memref<24x8xf32, #tpu.memory_space<vmem>>, %arg5: memref<24x1xf32, #tpu.memory_space<vmem>>, %arg6: memref<1x8x256xf32, #tpu.memory_space<vmem>>, %arg7: memref<1x4x256xf32, #tpu.memory_space<vmem>>, %arg8: memref<1x8x256xf32, #tpu.memory_space<vmem>>, %arg9: memref<1x8x256xf32, #tpu.memory_space<vmem>>) attributes {dimension_semantics = [#tpu.dimension_semantics<parallel>], iteration_bounds = array<i64: 2>, scalar_prefetch = 0 : i64, scratch_operands = 0 : i64, tpu.core_type = #tpu.core_type<tc>, window_params = [{pipeline_mode = #tpu.pipeline_mode<synchronous>, transform_indices = @transform_0, window_bounds = array<i64: 24, 8>}, {pipeline_mode = #tpu.pipeline_mode<synchronous>, transform_indices = @transform_1, window_bounds = array<i64: 1, 8>}, {pipeline_mode = #tpu.pipeline_mode<synchronous>, transform_indices = @transform_2, window_bounds = array<i64: 1, 8>}, {pipeline_mode = #tpu.pipeline_mode<synchronous>, transform_indices = @transform_3, window_bounds = array<i64: 24, 8>}, {pipeline_mode = #tpu.pipeline_mode<synchronous>, transform_indices = @transform_4, window_bounds = array<i64: 24, 1>}, {transform_indices = @transform_5, window_bounds = array<i64: 1, 8, 256>}, {transform_indices = @transform_6, window_bounds = array<i64: 1, 4, 256>}, {transform_indices = @transform_7, window_bounds = array<i64: 1, 8, 256>}, {transform_indices = @transform_8, window_bounds = array<i64: 1, 8, 256>}]} {
    %c0 = arith.constant 0 : index
    %c0_0 = arith.constant 0 : index
    %c0_1 = arith.constant 0 : index
    %0 = vector.load %arg6[%c0, %c0_0, %c0_1] : memref<1x8x256xf32, #tpu.memory_space<vmem>>, vector<1x8x256xf32>
    %1 = vector.shape_cast %0 : vector<1x8x256xf32> to vector<8x256xf32>
    %c0_2 = arith.constant 0 : index
    %c0_3 = arith.constant 0 : index
    %c0_4 = arith.constant 0 : index
    %2 = vector.load %arg7[%c0_2, %c0_3, %c0_4] : memref<1x4x256xf32, #tpu.memory_space<vmem>>, vector<1x4x256xf32>
    %3 = vector.shape_cast %2 : vector<1x4x256xf32> to vector<4x256xf32>
    %c0_5 = arith.constant 0 : index
    %c0_6 = arith.constant 0 : index
    %c0_7 = arith.constant 0 : index
    %4 = vector.load %arg8[%c0_5, %c0_6, %c0_7] : memref<1x8x256xf32, #tpu.memory_space<vmem>>, vector<1x8x256xf32>
    %5 = vector.shape_cast %4 : vector<1x8x256xf32> to vector<8x256xf32>
    %cst = arith.constant dense<0.000000e+00> : vector<8xf32>
    %6 = vector.multi_reduction <add>, %1, %cst [1] : vector<8x256xf32> to vector<8xf32>
    %7 = vector.shape_cast %6 : vector<8xf32> to vector<8x1xf32>
    %cst_8 = arith.constant 3.906250e-03 : f32
    %8 = vector.broadcast %cst_8 : f32 to vector<8x1xf32>
    %9 = arith.mulf %7, %8 : vector<8x1xf32>
    %cst_9 = arith.constant dense<0.000000e+00> : vector<4xf32>
    %10 = vector.multi_reduction <add>, %3, %cst_9 [1] : vector<4x256xf32> to vector<4xf32>
    %11 = vector.shape_cast %10 : vector<4xf32> to vector<4x1xf32>
    %cst_10 = arith.constant 3.906250e-03 : f32
    %12 = vector.broadcast %cst_10 : f32 to vector<4x1xf32>
    %13 = arith.mulf %11, %12 : vector<4x1xf32>
    %cst_11 = arith.constant dense<0.000000e+00> : vector<8xf32>
    %14 = vector.multi_reduction <add>, %5, %cst_11 [1] : vector<8x256xf32> to vector<8xf32>
    %15 = vector.shape_cast %14 : vector<8xf32> to vector<8x1xf32>
    %cst_12 = arith.constant 3.906250e-03 : f32
    %16 = vector.broadcast %cst_12 : f32 to vector<8x1xf32>
    %17 = arith.mulf %15, %16 : vector<8x1xf32>
    %cst_13 = arith.constant 0.000000e+00 : f32
    %18 = vector.broadcast %cst_13 : f32 to vector<1x8xf32>
    %c0_14 = arith.constant 0 : index
    %c0_15 = arith.constant 0 : index
    %19 = vector.load %arg1[%c0_14, %c0_15] : memref<24x8xf32, #tpu.memory_space<vmem>>, vector<8x8xf32>
    %20 = vector.broadcast %9 : vector<8x1xf32> to vector<8x8xf32>
    %21 = arith.mulf %19, %20 : vector<8x8xf32>
    %cst_16 = arith.constant dense<0.000000e+00> : vector<8xf32>
    %22 = vector.multi_reduction <add>, %21, %cst_16 [0] : vector<8x8xf32> to vector<8xf32>
    %23 = vector.shape_cast %22 : vector<8xf32> to vector<1x8xf32>
    %24 = arith.addf %18, %23 : vector<1x8xf32>
    %c8 = arith.constant 8 : index
    %c0_17 = arith.constant 0 : index
    %25 = vector.load %arg1[%c8, %c0_17] : memref<24x8xf32, #tpu.memory_space<vmem>>, vector<4x8xf32>
    %26 = vector.broadcast %13 : vector<4x1xf32> to vector<4x8xf32>
    %27 = arith.mulf %25, %26 : vector<4x8xf32>
    %cst_18 = arith.constant dense<0.000000e+00> : vector<8xf32>
    %28 = vector.multi_reduction <add>, %27, %cst_18 [0] : vector<4x8xf32> to vector<8xf32>
    %29 = vector.shape_cast %28 : vector<8xf32> to vector<1x8xf32>
    %30 = arith.addf %24, %29 : vector<1x8xf32>
    %c16 = arith.constant 16 : index
    %c0_19 = arith.constant 0 : index
    %31 = vector.load %arg1[%c16, %c0_19] : memref<24x8xf32, #tpu.memory_space<vmem>>, vector<8x8xf32>
    %32 = vector.broadcast %17 : vector<8x1xf32> to vector<8x8xf32>
    %33 = arith.mulf %31, %32 : vector<8x8xf32>
    %cst_20 = arith.constant dense<0.000000e+00> : vector<8xf32>
    %34 = vector.multi_reduction <add>, %33, %cst_20 [0] : vector<8x8xf32> to vector<8xf32>
    %35 = vector.shape_cast %34 : vector<8xf32> to vector<1x8xf32>
    %36 = arith.addf %30, %35 : vector<1x8xf32>
    %c0_21 = arith.constant 0 : index
    %c0_22 = arith.constant 0 : index
    %37 = vector.load %arg2[%c0_21, %c0_22] : memref<1x8xf32, #tpu.memory_space<vmem>>, vector<1x8xf32>
    %38 = arith.mulf %36, %37 : vector<1x8xf32>
    %c0_23 = arith.constant 0 : index
    %c0_24 = arith.constant 0 : index
    %39 = vector.load %arg3[%c0_23, %c0_24] : memref<1x8xf32, #tpu.memory_space<vmem>>, vector<1x8xf32>
    %40 = arith.addf %38, %39 : vector<1x8xf32>
    %cst_25 = arith.constant 0.000000e+00 : f32
    %41 = vector.broadcast %cst_25 : f32 to vector<1x8xf32>
    %42 = arith.maximumf %40, %41 : vector<1x8xf32>
    %c0_26 = arith.constant 0 : index
    %c0_27 = arith.constant 0 : index
    %43 = vector.load %arg4[%c0_26, %c0_27] : memref<24x8xf32, #tpu.memory_space<vmem>>, vector<24x8xf32>
    %44 = vector.broadcast %42 : vector<1x8xf32> to vector<24x8xf32>
    %45 = arith.mulf %43, %44 : vector<24x8xf32>
    %cst_28 = arith.constant dense<0.000000e+00> : vector<24xf32>
    %46 = vector.multi_reduction <add>, %45, %cst_28 [1] : vector<24x8xf32> to vector<24xf32>
    %47 = vector.shape_cast %46 : vector<24xf32> to vector<24x1xf32>
    %c0_29 = arith.constant 0 : index
    %c0_30 = arith.constant 0 : index
    %48 = vector.load %arg5[%c0_29, %c0_30] : memref<24x1xf32, #tpu.memory_space<vmem>>, vector<24x1xf32>
    %49 = arith.addf %47, %48 : vector<24x1xf32>
    %50 = vector.extract_strided_slice %49 {offsets = [0, 0], sizes = [8, 1], strides = [1, 1]} : vector<24x1xf32> to vector<8x1xf32>
    %cst_31 = arith.constant 0.000000e+00 : f32
    %51 = vector.broadcast %cst_31 : f32 to vector<8x1xf32>
    %52 = arith.subf %51, %50 : vector<8x1xf32>
    %53 = math.exp %52 : vector<8x1xf32>
    %cst_32 = arith.constant 1.000000e+00 : f32
    %54 = vector.broadcast %cst_32 : f32 to vector<8x1xf32>
    %55 = arith.addf %54, %53 : vector<8x1xf32>
    %cst_33 = arith.constant 1.000000e+00 : f32
    %56 = vector.broadcast %cst_33 : f32 to vector<8x1xf32>
    %57 = arith.divf %56, %55 : vector<8x1xf32>
    %58 = vector.extract_strided_slice %49 {offsets = [8, 0], sizes = [8, 1], strides = [1, 1]} : vector<24x1xf32> to vector<8x1xf32>
    %59 = vector.extract_strided_slice %49 {offsets = [16, 0], sizes = [8, 1], strides = [1, 1]} : vector<24x1xf32> to vector<8x1xf32>
    %60 = arith.maximumf %58, %59 : vector<8x1xf32>
    %61 = arith.subf %58, %60 : vector<8x1xf32>
    %62 = math.exp %61 : vector<8x1xf32>
    %63 = arith.subf %59, %60 : vector<8x1xf32>
    %64 = math.exp %63 : vector<8x1xf32>
    %65 = arith.addf %62, %64 : vector<8x1xf32>
    %66 = vector.broadcast %57 : vector<8x1xf32> to vector<8x256xf32>
    %67 = arith.mulf %1, %66 : vector<8x256xf32>
    %68 = vector.extract_strided_slice %62 {offsets = [0, 0], sizes = [4, 1], strides = [1, 1]} : vector<8x1xf32> to vector<4x1xf32>
    %69 = vector.extract_strided_slice %65 {offsets = [0, 0], sizes = [4, 1], strides = [1, 1]} : vector<8x1xf32> to vector<4x1xf32>
    %70 = arith.divf %68, %69 : vector<4x1xf32>
    %71 = vector.broadcast %70 : vector<4x1xf32> to vector<4x256xf32>
    %72 = arith.mulf %3, %71 : vector<4x256xf32>
    %73 = vector.extract_strided_slice %67 {offsets = [0, 0], sizes = [4, 256], strides = [1, 1]} : vector<8x256xf32> to vector<4x256xf32>
    %74 = arith.addf %73, %72 : vector<4x256xf32>
    %75 = vector.extract_strided_slice %67 {offsets = [4, 0], sizes = [4, 256], strides = [1, 1]} : vector<8x256xf32> to vector<4x256xf32>
    %76 = tpu.concatenate %74, %75 in 0 : vector<4x256xf32>, vector<4x256xf32> -> vector<8x256xf32>
    %77 = arith.divf %64, %65 : vector<8x1xf32>
    %78 = vector.broadcast %77 : vector<8x1xf32> to vector<8x256xf32>
    %79 = arith.mulf %5, %78 : vector<8x256xf32>
    %80 = arith.addf %76, %79 : vector<8x256xf32>
    %c0_34 = arith.constant 0 : index
    %c0_35 = arith.constant 0 : index
    %c0_36 = arith.constant 0 : index
    %81 = vector.load %arg9[%c0_34, %c0_35, %c0_36] : memref<1x8x256xf32, #tpu.memory_space<vmem>>, vector<1x8x256xf32>
    %82 = vector.shape_cast %81 : vector<1x8x256xf32> to vector<8x256xf32>
    %83 = vector.shape_cast %80 : vector<8x256xf32> to vector<1x8x256xf32>
    tpu.vector_store %arg9[%c0_34, %c0_35, %c0_36], %83 {strides = array<i32>} : memref<1x8x256xf32, #tpu.memory_space<vmem>>, vector<1x8x256xf32>,
    return
  }
  func.func @transform_0(%arg0: i32) -> (i32, i32) {
    %c0_i32 = arith.constant 0 : i32
    %c0_i32_0 = arith.constant 0 : i32
    %c0_i32_1 = arith.constant 0 : i32
    return %c0_i32, %c0_i32_0 : i32, i32
  }
  func.func @transform_1(%arg0: i32) -> (i32, i32) {
    %c0_i32 = arith.constant 0 : i32
    %c0_i32_0 = arith.constant 0 : i32
    %c0_i32_1 = arith.constant 0 : i32
    return %c0_i32, %c0_i32_0 : i32, i32
  }
  func.func @transform_2(%arg0: i32) -> (i32, i32) {
    %c0_i32 = arith.constant 0 : i32
    %c0_i32_0 = arith.constant 0 : i32
    %c0_i32_1 = arith.constant 0 : i32
    return %c0_i32, %c0_i32_0 : i32, i32
  }
  func.func @transform_3(%arg0: i32) -> (i32, i32) {
    %c0_i32 = arith.constant 0 : i32
    %c0_i32_0 = arith.constant 0 : i32
    %c0_i32_1 = arith.constant 0 : i32
    return %c0_i32, %c0_i32_0 : i32, i32
  }
  func.func @transform_4(%arg0: i32) -> (i32, i32) {
    %c0_i32 = arith.constant 0 : i32
    %c0_i32_0 = arith.constant 0 : i32
    %c0_i32_1 = arith.constant 0 : i32
    return %c0_i32, %c0_i32_0 : i32, i32
  }
  func.func @transform_5(%arg0: i32) -> (i32, i32, i32) {
    %c0_i32 = arith.constant 0 : i32
    %c0_i32_0 = arith.constant 0 : i32
    %c0_i32_1 = arith.constant 0 : i32
    return %arg0, %c0_i32, %c0_i32_0 : i32, i32, i32
  }
  func.func @transform_6(%arg0: i32) -> (i32, i32, i32) {
    %c0_i32 = arith.constant 0 : i32
    %c0_i32_0 = arith.constant 0 : i32
    %c0_i32_1 = arith.constant 0 : i32
    return %arg0, %c0_i32, %c0_i32_0 : i32, i32, i32
  }
  func.func @transform_7(%arg0: i32) -> (i32, i32, i32) {
    %c0_i32 = arith.constant 0 : i32
    %c0_i32_0 = arith.constant 0 : i32
    %c0_i32_1 = arith.constant 0 : i32
    return %arg0, %c0_i32, %c0_i32_0 : i32, i32, i32
  }
  func.func @transform_8(%arg0: i32) -> (i32, i32, i32) {
    %c0_i32 = arith.constant 0 : i32
    %c0_i32_0 = arith.constant 0 : i32
    %c0_i32_1 = arith.constant 0 : i32
    return %arg0, %c0_i32, %c0_i32_0 : i32, i32, i32
  }
}

</mosaic_0001>

<bundles_post_ra>
// kernel: tpu_custom_call.1
= control target key start
LH: loop header
LB: loop body
LE: loop exit
PB: predicated region body
PF: predicated region fallthrough
CT: control target
= control target key end

     0   :  { %13 = vsyncpa [#allocation3], 0  ;;  %s938_s0 = inlined_call_operand.vmem [shape: f32[24,8], index: 0, kind: input, shape index: {}]   ;;  %s939_s1 = inlined_call_operand.vmem [shape: f32[1,8], index: 1, kind: input, shape index: {}]   ;;  %s940_s2 = inlined_call_operand.vmem [shape: f32[1,8], index: 2, kind: input, shape index: {}]   ;;  %s941_s3 = inlined_call_operand.vmem [shape: f32[24,8], index: 3, kind: input, shape index: {}]   ;;  %s942_s4 = inlined_call_operand.vmem [shape: f32[24,1], index: 4, kind: input, shape index: {}]   ;;  %s943_s5 = inlined_call_operand.vmem [shape: f32[2,8,256], index: 5, kind: input, shape index: {}]   ;;  %s944_s6 = inlined_call_operand.vmem [shape: f32[2,4,256], index: 6, kind: input, shape index: {}]   ;;  %s945_s7 = inlined_call_operand.vmem [shape: f32[2,8,256], index: 7, kind: input, shape index: {}]   ;;  %s946_s8 = inlined_call_operand.hbm [shape: f32[2,8,256], index: 8, kind: output, shape index: {}]  }
   0x1   :  { %15 = vsyncpa [#allocation3 + $0x1], 0  ;;  %s768_s27 = smov 0   ;;  %s770_s28 = smov 0  }
   0x2   :  { %s772_s29 = smov 0   ;;  %s774_s30 = smov 0  }
   0x3 LB: > { %s789_s9 = sadd.s32 4294967295, %s718_s30   ;;  %s582_s10 = sadd.s32 4294967294, %s718_s30   ;;  %s718_s30 = sphi %s774_s30, %s952_s30   ;;  %s714_s29 = sphi %s772_s29, %s951_s29   ;;  %s710_s28 = sphi %s770_s28, %s950_s28   ;;  %s706_s27 = sphi %s768_s27, %s949_s27  }
   0x4   : > { %s793_s11 = sadd.s32 1, %s718_s30   ;;  %s211_s12 = sadd.s32 1, %s714_s29 }
   0x5   : > { %s208_s13 = ssub.s32 %s718_s30, %s793_s11  ;;  %p221_p0 = scmp.ne.s32.totalorder %s714_s29, %s710_s28 }
   0x6   : > { %p209_p1 = scmp.eq.s32.totalorder %s208_s13, 0  ;;  %p222_p2 = scmp.eq.s32.totalorder %s789_s9, 1 }
   0x7   : > { %p227_p3 = scmp.ne.s32.totalorder %s710_s28, %s706_s27  ;;  %p228_p4 = scmp.eq.s32.totalorder %s582_s10, 1 }
   0x8   : > { %s804_s14 = scalar_select %p209_p1, %s714_s29, %s211_s12  }
   0x9   : > { %p806_p5 = por %p222_p2, %p221_p0  ;;  %p810_p6 = por %p228_p4, %p227_p3 }
   0xa   : > { %p585_p7 = scmp.ge.s32.totalorder %s718_s30, 1  ;;  %p285_p8 = scmp.lt.s32.totalorder %s718_s30, 3 }
   0xc   : > { %p286_p9 = pnand %p585_p7, %p285_p8 }
   0xd   : > { %p329_p10 = scmp.lt.s32.totalorder (!%p286_p9), %s789_s9, 1  ;;  %vm356_vm0 = vcmask (!%p286_p9), 1043456   ;;  %v389_v11 = vld [vmem:[%s938_s0 + $0x10] sm:$0xff] (!%p286_p9)  ;;  %v367_v14 = vld [vmem:[%s938_s0] sm:$0xff] (!%p286_p9)  ;;  %vm369_vm1 = vcmask (!%p286_p9), 64512   ;;  %vm380_vm2 = vcmask (!%p286_p9), 60416   ;;  %v407_v43 = vlaneseq (!%p286_p9) }
   0xe   : > { %289 = sbr.rel (%p286_p9) target bundleno = 537 (0x219), region = 52  ;;  %v378_v20 = vld [vmem:[%s938_s0 + $0x8] sm:$0xf] (!%p286_p9)  ;;  %v399_v46 = vld [vmem:[%s939_s1] sm:$0x1] (!%p286_p9)  ;;  %v406_v54 = vld [vmem:[%s941_s3 + $0x10] sm:$0xff] (!%p286_p9) }
   0xf   : > { %v408_v48 = vshrl.u32 (!%p286_p9), %v407_v43, 7  ;;  %v401_v49 = vld [vmem:[%s940_s2] sm:$0x1] (!%p286_p9)  ;;  %v405_v55 = vld [vmem:[%s941_s3 + $0x8] sm:$0xff] (!%p286_p9)  ;;  %s601_s10 = sshll.u32 (!%p286_p9), %s789_s9, 8  ;;  %s722_s21 = smov (!%p286_p9), [#allocation2]  }
  0x10   : > { %v404_v57 = vld [vmem:[%s941_s3] sm:$0xff] (!%p286_p9) }
  0x11   : > { %v409_v52 = vsub.s32 (!%p286_p9), 0, %v408_v48 }
  0x15   : > { %s330_s17 = scalar_select %p329_p10, %s789_s9, 1 }
  0x17   : > { %s598_s18 = sshll.u32 %s330_s17, 4  ;;  %s599_s19 = sshll.u32 %s330_s17, 3 }
  0x18   : > { %s343_s22 = scalar_lea.vmem %s945_s7, %s598_s18  ;;  %s333_s25 = scalar_lea.vmem %s943_s5, %s598_s18 }
  0x19   : > { %v824_v0 = vld [vmem:[%s343_s22] sm:$0xff]  ;;  %v826_v1 = vld [vmem:[%s343_s22 + $0x8] sm:$0xff]  ;;  %s338_s12 = scalar_lea.vmem %s944_s6, %s599_s19  ;;  %s896_s19 = scalar_lea.hbm %s946_s8, %s601_s10 }
  0x1a   : > { %v828_v2 = vld [vmem:[%s333_s25] sm:$0xff]  ;;  %v363_v3 = vadd.f32 %v826_v1, %v824_v0  ;;  %v835_v4 = vld [vmem:[%s333_s25 + $0x8] sm:$0xff]  ;;  %s326_s25 = sand.u32 1, %s710_s28   ;;  %s660_s22 = sshll.u32 %s722_s21, 4  ;;  %s661_s22 = int_to_ptr.vmem [resolvable:$false] %s660_s22 }
  0x1b   : > { %v837_v5 = vld [vmem:[%s338_s12] sm:$0xff]  ;;  %v349_v6 = vadd.f32 %v835_v4, %v828_v2  ;;  %s586_s26 = sshll.u32 %s326_s25, 4  ;;  %s485_s9 = scalar_lea.sflag [#allocation3], %s326_s25 }
  0x1c   : > { %v354_v7 = vcombine.high %v837_v5, %v837_v5  ;;  %v357_v8 = vsel %vm356_vm0, %v837_v5, 0.0  ;;  %364 = vadd.xlane.f32.xlu1 %v363_v3  ;;  %v720_v3 = vmov 0   ;;  %s328_s12 = scalar_lea.vmem [#allocation2], %s586_s26  ;;  %s662_s23 = scalar_lea.vmem %s661_s22, 512 }
  0x1d   : > { %350 = vadd.xlane.f32.xlu0 %v349_v6  ;;  %644 = vset.pattern.permute.xlu1 %v720_v3  ;;  %v425_v6 = vld [vmem:[%s942_s4 + $0x10] sm:$0xff]  ;;  %s499_s13 = sshll.u32 %s328_s12, 4  ;;  %s898_s13 = int_to_ptr.vmem [resolvable:$true] %s499_s13 }
  0x1e   : > { %v358_v9 = vsel %vm356_vm0, %v354_v7, 0.0  ;;  %643 = vset.pattern.permute.xlu0 %v720_v3  ;;  %v424_v7 = vld [vmem:[%s942_s4 + $0x8] sm:$0xff]  ;;  %s656_s20 = scalar_lea.vmem %s898_s13, 256  ;;  %p663_p0 = scmp.lt.s32.totalorder %s898_s13, %s661_s22 }
  0x1f   : > { %v359_v10 = vadd.f32 %v358_v9, %v357_v8  ;;  %p657_p11 = scmp.ne.s32.totalorder %s898_s13, %s656_s20  ;;  %p664_p1 = scmp.lt.s32.totalorder %s662_s23, %s656_s20 }
  0x21   : > { %360 = vadd.xlane.f32.xlu0 %v359_v10  ;;  %p658_p12 = pnand %p657_p11, %p806_p5  ;;  %p665_p2 = por %p664_p1, %p663_p0 }
  0x23   : > { %p659_p13 = pneg %p658_p12 }
  0x25   : > { %p666_p3 = pnand %p665_p2, %p659_p13 }
  0xa9   : > { %v365_v12 = vpop.xlane.xlu1 %364 }
  0xaa   : > { %v366_v13 = vmul.f32 0.00390625, %v365_v12  ;;  %v351_v15 = vpop.xlane.xlu0 %350  ;;  %v423_v12 = vld [vmem:[%s942_s4] sm:$0xff] }
  0xab   : > { %v352_v16 = vmul.f32 0.00390625, %v351_v15 }
  0xac   : > { %v390_v17 = vmul.f32 %v389_v11, %v366_v13 }
  0xad   : > { %v368_v18 = vmul.f32 %v367_v14, %v352_v16 }
  0xae   : > { %v391_v19 = vsel %vm369_vm1, %v390_v17, 0.0  ;;  %v361_v21 = vpop.xlane.xlu0 %360 }
  0xaf   : > { %v392_v22 = vrot.slane %v391_v19, 4  ;;  %v370_v23 = vsel %vm369_vm1, %v368_v18, 0.0  ;;  %v362_v24 = vmul.f32 0.00390625, %v361_v21 }
  0xb0   : > { %v371_v25 = vrot.slane %v370_v23, 4 }
  0xb1   : > { %v393_v26 = vadd.f32 %v392_v22, %v391_v19  ;;  %v379_v27 = vmul.f32 %v378_v20, %v362_v24 }
  0xb2   : > { %v372_v28 = vadd.f32 %v371_v25, %v370_v23 }
  0xb3   : > { %v381_v29 = vsel %vm380_vm2, %v379_v27, 0.0  ;;  %v394_v30 = vrot.slane %v393_v26, 2 }
  0xb4   : > { %v373_v31 = vrot.slane %v372_v28, 2  ;;  %v382_v32 = vrot.slane %v381_v29, 4 }
  0xb5   : > { %v395_v35 = vadd.f32 %v394_v30, %v393_v26 }
  0xb6   : > { %v374_v33 = vadd.f32 %v373_v31, %v372_v28  ;;  %v383_v34 = vadd.f32 %v382_v32, %v381_v29  ;;  %v721_v31 = vmov 839922192  }
  0xb7   : > { %v396_v39 = vrot.slane %v395_v35, 1  ;;  %v457_v32 = vunpack.c.l.s4 %v721_v31 }
  0xb8   : > { %v384_v36 = vrot.slane %v383_v34, 2  ;;  %v375_v37 = vrot.slane %v374_v33, 1 }
  0xb9   : > { %v397_v44 = vadd.f32 %v396_v39, %v395_v35 }
  0xba   : > { %v385_v38 = vadd.f32 %v384_v36, %v383_v34  ;;  %v376_v41 = vadd.f32 %v375_v37, %v374_v33  ;;  %v458_v33 = vunpack.c.0.s8 %v457_v32 }
  0xbc   : > { %v386_v40 = vrot.slane %v385_v38, 1  ;;  %v461_v34 = vsub.s32 %v458_v33, %v408_v48 }
  0xbe   : > { %v387_v42 = vadd.f32 %v386_v40, %v385_v38 }
  0xc0   : > { %v388_v45 = vadd.f32 %v387_v42, %v376_v41 }
  0xc2   : > { %v398_v47 = vadd.f32 %v397_v44, %v388_v45 }
  0xc4   : > { %v400_v50 = vmul.f32 %v399_v46, %v398_v47 }
  0xc6   : > { %v402_v51 = vadd.f32 %v401_v49, %v400_v50 }
  0xc8   : > { %v403_v53 = vmax.f32 %v402_v51, 0.0 }
  0xca   : > { %v410_v56 = vrot.slane %v403_v53, %v409_v52 }
  0xcc   : > { %v413_v58 = vmul.f32 %v410_v56, %v406_v54  ;;  %v412_v59 = vmul.f32 %v410_v56, %v405_v55  ;;  %v411_v62 = vmul.f32 %v410_v56, %v404_v57 }
  0xce   : > { %v420_v60 = vsel %vm369_vm1, %v413_v58, 0.0  ;;  %v417_v61 = vsel %vm369_vm1, %v412_v59, 0.0  ;;  %v414_v63 = vsel %vm369_vm1, %v411_v62, 0.0 }
  0xcf   : > { %421 = vadd.xlane.f32.xlu0 %v420_v60  ;;  %418 = vadd.xlane.f32.xlu1 %v417_v61 }
  0xd3   : > { %415 = vadd.xlane.f32.xlu1 %v414_v63 }
 0x15c   : > { %v422_v8 = vpop.xlane.xlu0 %421  ;;  %v419_v9 = vpop.xlane.xlu1 %418 }
 0x15d   : > { %v428_v10 = vadd.f32 %v425_v6, %v422_v8  ;;  %v427_v11 = vadd.f32 %v424_v7, %v419_v9 }
 0x15f   : > { %v435_v13 = vmax.f32 %v427_v11, %v428_v10 }
 0x160   : > { %v416_v14 = vpop.xlane.xlu1 %415 }
 0x161   : > { %v436_v15 = vsub.f32 %v427_v11, %v435_v13  ;;  %v439_v16 = vsub.f32 %v428_v10, %v435_v13  ;;  %v426_v17 = vadd.f32 %v423_v12, %v416_v14 }
 0x163   : > { %v437_v18 = vmul.f32 1.442695, %v436_v15  ;;  %v440_v19 = vmul.f32 1.442695, %v439_v16  ;;  %v429_v20 = vsub.f32 0.0, %v426_v17 }
 0x165   : > { %646 = vpow2.f32 %v437_v18  ;;  %v430_v21 = vmul.f32 1.442695, %v429_v20 }
 0x166   : > { %648 = vpow2.f32 %v440_v19 }
 0x167   : > { %650 = vpow2.f32 %v430_v21 }
 0x16f   : > { %v647_v22 = vpop.eup %646 }
 0x170   : > { %v649_v23 = vpop.eup %648 }
 0x171   : > { %v651_v24 = vpop.eup %650  ;;  %v442_v25 = vadd.f32 %v649_v23, %v647_v22 }
 0x172   : > { %v432_v26 = vadd.f32 1.0, %v651_v24 }
 0x173   : > { %652 = vrcp.f32 %v442_v25 }
 0x174   : > { %654 = vrcp.f32 %v432_v26 }
 0x17d   : > { %v653_v27 = vpop.eup %652 }
 0x17e   : > { %v655_v28 = vpop.eup %654  ;;  %v451_v29 = vmul.f32 %v653_v27, %v647_v22  ;;  %v472_v30 = vmul.f32 %v653_v27, %v649_v23 }
 0x17f   : > { %445 = vperm.xlu1 %644, %v655_v28  }
 0x180   : > { %454 = vperm.xlu0 %643, %v451_v29  }
 0x183   : > { %475 = vperm.xlu1 %644, %v472_v30  }
 0x1fe   : > { %v446_v35 = vpop.permute.xlu1 %445 }
 0x1ff   : > { %v455_v36 = vpop.permute.xlu0 %454  ;;  %v448_v39 = vmul.f32 %v446_v35, %v828_v2  ;;  %v449_v43 = vmul.f32 %v446_v35, %v835_v4 }
 0x200   : > { %v462_v37 = vrot.slane %v455_v36, %v461_v34 }
 0x202   : > { %v464_v38 = vmul.f32 %v462_v37, %v837_v5  ;;  %v476_v40 = vpop.permute.xlu1 %475 }
 0x203   : > { %v478_v41 = vmul.f32 %v476_v40, %v824_v0  ;;  %v479_v47 = vmul.f32 %v476_v40, %v826_v1 }
 0x204   : > { %v466_v42 = vcombine.high %v464_v38, %v464_v38  ;;  %v468_v44 = vadd.f32 %v464_v38, %v448_v39 }
 0x206   : > { %v469_v45 = vadd.f32 %v466_v42, %v449_v43  ;;  %v470_v46 = vsel %vm356_vm0, %v468_v44, %v448_v39 }
 0x207   : > { %v480_v48 = vadd.f32 %v478_v41, %v470_v46 }
 0x208   : > { %v471_v5 = vsel %vm356_vm0, %v469_v45, %v449_v43 }
 0x209   : > { %v481_v2 = vadd.f32 %v479_v47, %v471_v5  ;;  %482 = vst [vmem:[%s328_s12] sm:$0xff] %v480_v48 }
 0x20b   : > { %483 = vst [vmem:[%s328_s12 + $0x8] sm:$0xff] %v481_v2 }
 0x20c   : > { %669 = shalt.err (!%p666_p3)
}
 0x20d   : > { %s670_s24 = scalar_lea.hbm %s896_s19, 256  ;;  %s674_s10 = scalar_lea.hbm %s946_s8, 512 }
 0x20e   : > { %p671_p4 = scmp.ne.s32.totalorder %s896_s19, %s670_s24  ;;  %p675_p9 = scmp.lt.u32.totalorder %s896_s19, %s946_s8 }
 0x20f   : > { %p676_p10 = scmp.lt.u32.totalorder %s674_s10, %s670_s24  ;;  %p678_p12 = scmp.lt.u32.totalorder %s670_s24, %s896_s19 }
 0x210   : > { %p672_p7 = pnand %p671_p4, %p806_p5 }
 0x211   : > { %p677_p11 = por %p676_p10, %p675_p9 }
 0x212   : > { %p673_p8 = pneg %p672_p7 }
 0x213   : > { %p679_p13 = por %p678_p12, %p677_p11 }
 0x215   : > { %p680_p0 = pnand %p679_p13, %p673_p8 }
 0x217   : > { %683 = shalt.err (!%p680_p0)
}
 0x218   : > { %602 = dma.vmem_to_hbm [thread:$0]  (%p806_p5), %s898_s13, 256, %s896_s19, %s485_s9  }
 0x219 PF: > { %p608_p1 = scmp.ge.s32.totalorder %s718_s30, 2  ;;  %s511_s18 = sand.u32 1, %s706_s27  }
 0x21a   : > { %s512_s20 = scalar_lea.sflag [#allocation3], %s511_s18 }
 0x21b   : > { %p605_p2 = pnand %p608_p1, %p810_p6 }
 0x21d   : > { %701 = dma.done.wait (!%p605_p2), %s512_s20, 256  }
 0x21e   : > { %703 = vsyncadd (!%p605_p2), %s512_s20, 4294967040  ;;  %p18_p3 = scmp.ge.s32.totalorder %s793_s11, 4   ;;  %s949_s27 = smov %s710_s28 }
 0x21f   : > { %s950_s28 = smov %s714_s29  ;;  %s951_s29 = smov %s804_s14 }
 0x220   : > { %s952_s30 = smov %s793_s11  ;;  %20 = sbr.rel (!%p18_p3) target bundleno = 3 (0x3), region = 93 }
 0x227   :  { %517 = vsyncpa [#allocation3], 1 }
 0x228   :  { %519 = vsyncpa [#allocation3 + $0x1], 1 }

</bundles_post_ra>
